<compile_context>
chip_gen: v7x
topology: tpu7x:2x2x1
jax: 0.10.0
libtpu: 0.0.40
codegen_flags: <defaults>
</compile_context>

<pallas_src>
import functools

import jax
import jax.numpy as jnp
from jax.experimental import pallas as pl
from jax.experimental.pallas import tpu as pltpu


def _round_up(x, m):
    return ((x + m - 1) // m) * m


def _elementwise_bf16_default():
    """Packed-bf16 bias+ReLU on v6e/v7x; f32 elementwise on v5e (no bf16 VALU)."""
    try:
        kind = jax.devices()[0].device_kind.lower()
    except Exception:
        return True
    return not ("v5 lite" in kind or "v5e" in kind or "v5litepod" in kind)


def ppo_kernel(obs_ref,
               w1_ref, b1_ref,
               w2_ref, b2_ref,
               w3_ref, b3_ref,
               hw1_ref, hb1_ref,
               hw2_ref, hb2_ref,
               out_ref,
               *, elementwise_bf16):
    """Fused PPO actor-critic forward for one batch tile (all matmuls bf16->f32)."""
    x = obs_ref[...]
    if x.dtype != jnp.bfloat16:
        x = x.astype(jnp.bfloat16)

    def bias_relu(h32, b_ref):
        # h32 is the f32 MXU output; return a bf16 activation ready for the next matmul.
        if elementwise_bf16:
            # v6e/v7x: single cast, then packed-bf16 add + ReLU on the VPU.
            return jnp.maximum(h32.astype(jnp.bfloat16) + b_ref[...].astype(jnp.bfloat16),
                               0.0)
        # v5e: f32 add + ReLU, cast once for the next MXU op.
        return jnp.maximum(h32 + b_ref[...], 0.0).astype(jnp.bfloat16)

    # shared_net: Linear+ReLU x3 (Dropout = identity in eval mode)
    h = bias_relu(jnp.dot(x, w1_ref[...], preferred_element_type=jnp.float32), b1_ref)
    h = bias_relu(jnp.dot(h, w2_ref[...], preferred_element_type=jnp.float32), b2_ref)
    h = bias_relu(jnp.dot(h, w3_ref[...], preferred_element_type=jnp.float32), b3_ref)

    # fused heads stage 1: [policy_fc1 | value_fc1] -> (TB, 128), ReLU
    g = bias_relu(jnp.dot(h, hw1_ref[...], preferred_element_type=jnp.float32), hb1_ref)

    # fused heads stage 2: block-diagonal [pw2; vw2] padded to 128 lanes; final add in f32.
    out = jnp.dot(g, hw2_ref[...], preferred_element_type=jnp.float32) + hb2_ref[...]
    out_ref[...] = out.astype(out_ref.dtype)   # lane-dense (TB, 128) bf16 store


def custom_ppo_forward(obs, fused, *, block_b=None, elementwise_bf16=None,
                       interpret=False):
    """Run the fused PPO forward. Returns (policy_logits (B,n_actions) f32, value (B,1) f32)."""
    B, n_input = obs.shape
    n_actions = fused["n_actions"]
    n_in_pad = fused["w1"].shape[0]          # K of first matmul, padded to 128
    NOUT = fused["hw2"].shape[1]             # lane-dense output width (>=128)
    if elementwise_bf16 is None:
        elementwise_bf16 = _elementwise_bf16_default()

    # ---- batch tiling -------------------------------------------------------
    if block_b is None:
        b8 = _round_up(max(B, 8), 8)
        if b8 <= 256:
            block_b = b8                     # small batch: one tile, latency-bound anyway
        else:
            # >=2 grid steps so ("parallel",) shards across v7x's 2 TCs; cap 1024 rows.
            block_b = min(1024, max(128, _round_up(pl.cdiv(b8, 2), 8)))
    block_b = _round_up(block_b, 8)
    Bp = _round_up(max(B, block_b), block_b)

    pad_rows = Bp - B
    pad_cols = n_in_pad - n_input
    if pad_rows or pad_cols:
        obs = jnp.pad(obs, ((0, pad_rows), (0, pad_cols)))

    grid = (Bp // block_b,)

    weight_args = (fused["w1"], fused["b1"],
                   fused["w2"], fused["b2"],
                   fused["w3"], fused["b3"],
                   fused["hw1"], fused["hb1"],
                   fused["hw2"], fused["hb2"])

    in_specs = [pl.BlockSpec((block_b, n_in_pad), lambda i: (i, 0))]
    # Weights/biases: full-array blocks with constant index_map -> resident in VMEM
    # across grid steps (loaded once, not re-DMA'd per batch tile).
    in_specs += [pl.BlockSpec(w.shape, lambda i: (0, 0)) for w in weight_args]

    flops = 2 * Bp * (n_in_pad * 512 + 512 * 256 + 256 * 128 + 128 * 128 + 128 * NOUT)
    bytes_accessed = (Bp * n_in_pad * obs.dtype.itemsize
                      + sum(int(w.size) * w.dtype.itemsize for w in weight_args)
                      + Bp * NOUT * 2)       # bf16 output slab

    out = pl.pallas_call(
        functools.partial(ppo_kernel, elementwise_bf16=elementwise_bf16),
        grid=grid,
        in_specs=in_specs,
        out_specs=pl.BlockSpec((block_b, NOUT), lambda i: (i, 0)),
        out_shape=jax.ShapeDtypeStruct((Bp, NOUT), jnp.bfloat16),
        compiler_params=pltpu.CompilerParams(
            dimension_semantics=("parallel",),        # batch axis over both TCs on v7x
            vmem_limit_bytes=32 * 1024 * 1024),       # lift v5e's 16 MiB scoped default
        cost_estimate=pl.CostEstimate(flops=flops, transcendentals=0,
                                      bytes_accessed=bytes_accessed),
        interpret=interpret,
    )(obs, *weight_args)

    policy = out[:B, :n_actions].astype(jnp.float32)
    value = out[:B, n_actions:n_actions + 1].astype(jnp.float32)
    return policy, value


def init_raw_params(key, n_input, n_actions):
    """Deterministic synthetic init (PyTorch-like). Weights (in,out) f32; biases (1,out) f32."""
    dims = [
        ("w1", "b1", n_input, 512),
        ("w2", "b2", 512, 256),
        ("w3", "b3", 256, 128),
        ("pw1", "pb1", 128, 64),
        ("pw2", "pb2", 64, n_actions),
        ("vw1", "vb1", 128, 64),
        ("vw2", "vb2", 64, 1),
    ]
    params = {}
    for wname, bname, fin, fout in dims:
        key, kw, kb = jax.random.split(key, 3)
        scale = 1.0 / jnp.sqrt(jnp.float32(fin))
        params[wname] = jax.random.uniform(kw, (fin, fout), jnp.float32, -scale, scale)
        params[bname] = jax.random.uniform(kb, (1, fout), jnp.float32, -scale, scale)
    return params


def fuse_params(raw, n_actions):
    """Fuse heads, pad w1's K dim to 128, cast weights to bf16 (biases stay f32)."""
    n_in = raw["w1"].shape[0]
    n_in_pad = _round_up(n_in, 128)
    n_out_pad = max(128, _round_up(n_actions + 1, 128))

    w1 = raw["w1"]
    if n_in_pad != n_in:
        w1 = jnp.pad(w1, ((0, n_in_pad - n_in), (0, 0)))    # zero rows: no effect

    hw1 = jnp.concatenate([raw["pw1"], raw["vw1"]], axis=1)      # (128, 128)
    hb1 = jnp.concatenate([raw["pb1"], raw["vb1"]], axis=1)      # (1, 128)

    # Strictly block-diagonal second stage: pw2 in rows 0:64 / cols 0:n_actions,
    # vw2 in rows 64:128 / col n_actions, zeros elsewhere (no policy<->value leakage).
    hw2 = jnp.zeros((128, n_out_pad), jnp.float32)
    hw2 = hw2.at[:64, :n_actions].set(raw["pw2"])
    hw2 = hw2.at[64:, n_actions].set(raw["vw2"][:, 0])
    hb2 = jnp.zeros((1, n_out_pad), jnp.float32)
    hb2 = hb2.at[:, :n_actions].set(raw["pb2"])
    hb2 = hb2.at[:, n_actions].set(raw["vb2"][0, 0])

    return {
        "w1": w1.astype(jnp.bfloat16), "b1": raw["b1"],
        "w2": raw["w2"].astype(jnp.bfloat16), "b2": raw["b2"],
        "w3": raw["w3"].astype(jnp.bfloat16), "b3": raw["b3"],
        "hw1": hw1.astype(jnp.bfloat16), "hb1": hb1,
        "hw2": hw2.astype(jnp.bfloat16), "hb2": hb2,
        "n_actions": n_actions,
    }


def reference_forward(obs, raw, *, elementwise_bf16):
    """Pure-JAX reference mirroring the kernel's bf16 quantization exactly."""
    bf16, f32 = jnp.bfloat16, jnp.float32

    def dotf(a, b):
        return jnp.dot(a.astype(bf16).astype(f32), b.astype(bf16).astype(f32),
                       precision=jax.lax.Precision.HIGHEST)

    def bias_relu(h32, b):
        if elementwise_bf16:
            return jnp.maximum(h32.astype(bf16) + b.astype(bf16), 0.0)   # bf16
        return jnp.maximum(h32 + b, 0.0)                                  # f32

    h = bias_relu(dotf(obs, raw["w1"]), raw["b1"])
    h = bias_relu(dotf(h, raw["w2"]), raw["b2"])
    sh = bias_relu(dotf(h, raw["w3"]), raw["b3"])
    p = bias_relu(dotf(sh, raw["pw1"]), raw["pb1"])
    p = dotf(p, raw["pw2"]) + raw["pb2"]
    v = bias_relu(dotf(sh, raw["vw1"]), raw["vb1"])
    v = dotf(v, raw["vw2"]) + raw["vb2"]
    # mirror the kernel's bf16 output slab store
    return p.astype(bf16).astype(f32), v.astype(bf16).astype(f32)


if __name__ == "__main__":
    key = jax.random.PRNGKey(0)
    B = 2           # batch (small example; wrapper pads to a full sublane group)
    n_input = 256   # observation embedding dim
    n_actions = 8   # discrete action space size

    kobs, kparams = jax.random.split(key)
    obs = jax.random.normal(kobs, (B, n_input), jnp.float32)
    raw = init_raw_params(kparams, n_input, n_actions)
    fused = fuse_params(raw, n_actions)
    ew_bf16 = _elementwise_bf16_default()

    policy_logits, value = custom_ppo_forward(obs, fused, elementwise_bf16=ew_bf16)
    policy_logits, value = jax.block_until_ready((policy_logits, value))

    ref_p, ref_v = reference_forward(obs, raw, elementwise_bf16=ew_bf16)
    assert policy_logits.shape == (B, n_actions)
    assert value.shape == (B, 1)
    assert jnp.allclose(policy_logits, ref_p, atol=2e-2, rtol=2e-2)
    assert jnp.allclose(value, ref_v, atol=2e-2, rtol=2e-2)

    # exercise the multi-tile path (>=2 grid steps + batch padding)
    obs2 = jax.random.normal(jax.random.fold_in(kobs, 1), (300, n_input), jnp.float32)
    p2, v2 = jax.block_until_ready(
        custom_ppo_forward(obs2, fused, elementwise_bf16=ew_bf16))
    rp2, rv2 = reference_forward(obs2, raw, elementwise_bf16=ew_bf16)
    assert p2.shape == (300, n_actions) and v2.shape == (300, 1)
    assert jnp.allclose(p2, rp2, atol=2e-2, rtol=2e-2)
    assert jnp.allclose(v2, rv2, atol=2e-2, rtol=2e-2)

    print("KERNEL_OK")
</pallas_src>

<mosaic_0001>
module attributes {stable_mosaic.version = 11 : i64} {
  func.func @ppo_kernel(%arg0: i32, %arg1: memref<8x256xf32, #tpu.memory_space<vmem>>, %arg2: memref<256x512xbf16, #tpu.memory_space<vmem>>, %arg3: memref<1x512xf32, #tpu.memory_space<vmem>>, %arg4: memref<512x256xbf16, #tpu.memory_space<vmem>>, %arg5: memref<1x256xf32, #tpu.memory_space<vmem>>, %arg6: memref<256x128xbf16, #tpu.memory_space<vmem>>, %arg7: memref<1x128xf32, #tpu.memory_space<vmem>>, %arg8: memref<128x128xbf16, #tpu.memory_space<vmem>>, %arg9: memref<1x128xf32, #tpu.memory_space<vmem>>, %arg10: memref<128x128xbf16, #tpu.memory_space<vmem>>, %arg11: memref<1x128xf32, #tpu.memory_space<vmem>>, %arg12: memref<8x128xbf16, #tpu.memory_space<vmem>>) attributes {dimension_semantics = [#tpu.dimension_semantics<parallel>], iteration_bounds = array<i64: 1>, scalar_prefetch = 0 : i64, scratch_operands = 0 : i64, tpu.core_type = #tpu.core_type<tc>, window_params = [{transform_indices = @transform_0, window_bounds = array<i64: 8, 256>}, {pipeline_mode = #tpu.pipeline_mode<synchronous>, transform_indices = @transform_1, window_bounds = array<i64: 256, 512>}, {pipeline_mode = #tpu.pipeline_mode<synchronous>, transform_indices = @transform_2, window_bounds = array<i64: 1, 512>}, {pipeline_mode = #tpu.pipeline_mode<synchronous>, transform_indices = @transform_3, window_bounds = array<i64: 512, 256>}, {pipeline_mode = #tpu.pipeline_mode<synchronous>, transform_indices = @transform_4, window_bounds = array<i64: 1, 256>}, {pipeline_mode = #tpu.pipeline_mode<synchronous>, transform_indices = @transform_5, window_bounds = array<i64: 256, 128>}, {pipeline_mode = #tpu.pipeline_mode<synchronous>, transform_indices = @transform_6, window_bounds = array<i64: 1, 128>}, {pipeline_mode = #tpu.pipeline_mode<synchronous>, transform_indices = @transform_7, window_bounds = array<i64: 128, 128>}, {pipeline_mode = #tpu.pipeline_mode<synchronous>, transform_indices = @transform_8, window_bounds = array<i64: 1, 128>}, {pipeline_mode = #tpu.pipeline_mode<synchronous>, transform_indices = @transform_9, window_bounds = array<i64: 128, 128>}, {pipeline_mode = #tpu.pipeline_mode<synchronous>, transform_indices = @transform_10, window_bounds = array<i64: 1, 128>}, {transform_indices = @transform_11, window_bounds = array<i64: 8, 128>}]} {
    %c0 = arith.constant 0 : index
    %c0_0 = arith.constant 0 : index
    %0 = vector.load %arg1[%c0, %c0_0] : memref<8x256xf32, #tpu.memory_space<vmem>>, vector<8x256xf32>
    %1 = arith.truncf %0 : vector<8x256xf32> to vector<8x256xbf16>
    %c0_1 = arith.constant 0 : index
    %c0_2 = arith.constant 0 : index
    %2 = vector.load %arg2[%c0_1, %c0_2] : memref<256x512xbf16, #tpu.memory_space<vmem>>, vector<256x512xbf16>
    %cst = arith.constant dense<0.000000e+00> : vector<8x512xf32>
    %3 = tpu.matmul %1, %2, %cst {dimension_numbers = #tpu.dot_dimension_numbers<[1], [0], [0], [1], [0, 0, 1, 1], [], []>} : vector<8x256xbf16>, vector<256x512xbf16>, vector<8x512xf32> -> vector<8x512xf32>
    %4 = arith.truncf %3 : vector<8x512xf32> to vector<8x512xbf16>
    %c0_3 = arith.constant 0 : index
    %c0_4 = arith.constant 0 : index
    %5 = vector.load %arg3[%c0_3, %c0_4] : memref<1x512xf32, #tpu.memory_space<vmem>>, vector<1x512xf32>
    %6 = arith.truncf %5 : vector<1x512xf32> to vector<1x512xbf16>
    %7 = vector.broadcast %6 : vector<1x512xbf16> to vector<8x512xbf16>
    %8 = arith.addf %4, %7 : vector<8x512xbf16>
    %cst_5 = arith.constant 0.000000e+00 : bf16
    %9 = vector.broadcast %cst_5 : bf16 to vector<8x512xbf16>
    %10 = arith.maximumf %8, %9 : vector<8x512xbf16>
    %c0_6 = arith.constant 0 : index
    %c0_7 = arith.constant 0 : index
    %11 = vector.load %arg4[%c0_6, %c0_7] : memref<512x256xbf16, #tpu.memory_space<vmem>>, vector<512x256xbf16>
    %cst_8 = arith.constant dense<0.000000e+00> : vector<8x256xf32>
    %12 = tpu.matmul %10, %11, %cst_8 {dimension_numbers = #tpu.dot_dimension_numbers<[1], [0], [0], [1], [0, 0, 1, 1], [], []>} : vector<8x512xbf16>, vector<512x256xbf16>, vector<8x256xf32> -> vector<8x256xf32>
    %13 = arith.truncf %12 : vector<8x256xf32> to vector<8x256xbf16>
    %c0_9 = arith.constant 0 : index
    %c0_10 = arith.constant 0 : index
    %14 = vector.load %arg5[%c0_9, %c0_10] : memref<1x256xf32, #tpu.memory_space<vmem>>, vector<1x256xf32>
    %15 = arith.truncf %14 : vector<1x256xf32> to vector<1x256xbf16>
    %16 = vector.broadcast %15 : vector<1x256xbf16> to vector<8x256xbf16>
    %17 = arith.addf %13, %16 : vector<8x256xbf16>
    %cst_11 = arith.constant 0.000000e+00 : bf16
    %18 = vector.broadcast %cst_11 : bf16 to vector<8x256xbf16>
    %19 = arith.maximumf %17, %18 : vector<8x256xbf16>
    %c0_12 = arith.constant 0 : index
    %c0_13 = arith.constant 0 : index
    %20 = vector.load %arg6[%c0_12, %c0_13] : memref<256x128xbf16, #tpu.memory_space<vmem>>, vector<256x128xbf16>
    %cst_14 = arith.constant dense<0.000000e+00> : vector<8x128xf32>
    %21 = tpu.matmul %19, %20, %cst_14 {dimension_numbers = #tpu.dot_dimension_numbers<[1], [0], [0], [1], [0, 0, 1, 1], [], []>} : vector<8x256xbf16>, vector<256x128xbf16>, vector<8x128xf32> -> vector<8x128xf32>
    %22 = arith.truncf %21 : vector<8x128xf32> to vector<8x128xbf16>
    %c0_15 = arith.constant 0 : index
    %c0_16 = arith.constant 0 : index
    %23 = vector.load %arg7[%c0_15, %c0_16] : memref<1x128xf32, #tpu.memory_space<vmem>>, vector<1x128xf32>
    %24 = arith.truncf %23 : vector<1x128xf32> to vector<1x128xbf16>
    %25 = vector.broadcast %24 : vector<1x128xbf16> to vector<8x128xbf16>
    %26 = arith.addf %22, %25 : vector<8x128xbf16>
    %cst_17 = arith.constant 0.000000e+00 : bf16
    %27 = vector.broadcast %cst_17 : bf16 to vector<8x128xbf16>
    %28 = arith.maximumf %26, %27 : vector<8x128xbf16>
    %c0_18 = arith.constant 0 : index
    %c0_19 = arith.constant 0 : index
    %29 = vector.load %arg8[%c0_18, %c0_19] : memref<128x128xbf16, #tpu.memory_space<vmem>>, vector<128x128xbf16>
    %cst_20 = arith.constant dense<0.000000e+00> : vector<8x128xf32>
    %30 = tpu.matmul %28, %29, %cst_20 {dimension_numbers = #tpu.dot_dimension_numbers<[1], [0], [0], [1], [0, 0, 1, 1], [], []>} : vector<8x128xbf16>, vector<128x128xbf16>, vector<8x128xf32> -> vector<8x128xf32>
    %31 = arith.truncf %30 : vector<8x128xf32> to vector<8x128xbf16>
    %c0_21 = arith.constant 0 : index
    %c0_22 = arith.constant 0 : index
    %32 = vector.load %arg9[%c0_21, %c0_22] : memref<1x128xf32, #tpu.memory_space<vmem>>, vector<1x128xf32>
    %33 = arith.truncf %32 : vector<1x128xf32> to vector<1x128xbf16>
    %34 = vector.broadcast %33 : vector<1x128xbf16> to vector<8x128xbf16>
    %35 = arith.addf %31, %34 : vector<8x128xbf16>
    %cst_23 = arith.constant 0.000000e+00 : bf16
    %36 = vector.broadcast %cst_23 : bf16 to vector<8x128xbf16>
    %37 = arith.maximumf %35, %36 : vector<8x128xbf16>
    %c0_24 = arith.constant 0 : index
    %c0_25 = arith.constant 0 : index
    %38 = vector.load %arg10[%c0_24, %c0_25] : memref<128x128xbf16, #tpu.memory_space<vmem>>, vector<128x128xbf16>
    %cst_26 = arith.constant dense<0.000000e+00> : vector<8x128xf32>
    %39 = tpu.matmul %37, %38, %cst_26 {dimension_numbers = #tpu.dot_dimension_numbers<[1], [0], [0], [1], [0, 0, 1, 1], [], []>} : vector<8x128xbf16>, vector<128x128xbf16>, vector<8x128xf32> -> vector<8x128xf32>
    %c0_27 = arith.constant 0 : index
    %c0_28 = arith.constant 0 : index
    %40 = vector.load %arg11[%c0_27, %c0_28] : memref<1x128xf32, #tpu.memory_space<vmem>>, vector<1x128xf32>
    %41 = vector.broadcast %40 : vector<1x128xf32> to vector<8x128xf32>
    %42 = arith.addf %39, %41 : vector<8x128xf32>
    %43 = arith.truncf %42 : vector<8x128xf32> to vector<8x128xbf16>
    %c0_29 = arith.constant 0 : index
    %c0_30 = arith.constant 0 : index
    %44 = vector.load %arg12[%c0_29, %c0_30] : memref<8x128xbf16, #tpu.memory_space<vmem>>, vector<8x128xbf16>
    tpu.vector_store %arg12[%c0_29, %c0_30], %43 {strides = array<i32>} : memref<8x128xbf16, #tpu.memory_space<vmem>>, vector<8x128xbf16>,
    return
  }
  func.func @transform_0(%arg0: i32) -> (i32, i32) {
    %c0_i32 = arith.constant 0 : i32
    %c0_i32_0 = arith.constant 0 : i32
    return %arg0, %c0_i32 : i32, i32
  }
  func.func @transform_1(%arg0: i32) -> (i32, i32) {
    %c0_i32 = arith.constant 0 : i32
    %c0_i32_0 = arith.constant 0 : i32
    %c0_i32_1 = arith.constant 0 : i32
    return %c0_i32, %c0_i32_0 : i32, i32
  }
  func.func @transform_2(%arg0: i32) -> (i32, i32) {
    %c0_i32 = arith.constant 0 : i32
    %c0_i32_0 = arith.constant 0 : i32
    %c0_i32_1 = arith.constant 0 : i32
    return %c0_i32, %c0_i32_0 : i32, i32
  }
  func.func @transform_3(%arg0: i32) -> (i32, i32) {
    %c0_i32 = arith.constant 0 : i32
    %c0_i32_0 = arith.constant 0 : i32
    %c0_i32_1 = arith.constant 0 : i32
    return %c0_i32, %c0_i32_0 : i32, i32
  }
  func.func @transform_4(%arg0: i32) -> (i32, i32) {
    %c0_i32 = arith.constant 0 : i32
    %c0_i32_0 = arith.constant 0 : i32
    %c0_i32_1 = arith.constant 0 : i32
    return %c0_i32, %c0_i32_0 : i32, i32
  }
  func.func @transform_5(%arg0: i32) -> (i32, i32) {
    %c0_i32 = arith.constant 0 : i32
    %c0_i32_0 = arith.constant 0 : i32
    %c0_i32_1 = arith.constant 0 : i32
    return %c0_i32, %c0_i32_0 : i32, i32
  }
  func.func @transform_6(%arg0: i32) -> (i32, i32) {
    %c0_i32 = arith.constant 0 : i32
    %c0_i32_0 = arith.constant 0 : i32
    %c0_i32_1 = arith.constant 0 : i32
    return %c0_i32, %c0_i32_0 : i32, i32
  }
  func.func @transform_7(%arg0: i32) -> (i32, i32) {
    %c0_i32 = arith.constant 0 : i32
    %c0_i32_0 = arith.constant 0 : i32
    %c0_i32_1 = arith.constant 0 : i32
    return %c0_i32, %c0_i32_0 : i32, i32
  }
  func.func @transform_8(%arg0: i32) -> (i32, i32) {
    %c0_i32 = arith.constant 0 : i32
    %c0_i32_0 = arith.constant 0 : i32
    %c0_i32_1 = arith.constant 0 : i32
    return %c0_i32, %c0_i32_0 : i32, i32
  }
  func.func @transform_9(%arg0: i32) -> (i32, i32) {
    %c0_i32 = arith.constant 0 : i32
    %c0_i32_0 = arith.constant 0 : i32
    %c0_i32_1 = arith.constant 0 : i32
    return %c0_i32, %c0_i32_0 : i32, i32
  }
  func.func @transform_10(%arg0: i32) -> (i32, i32) {
    %c0_i32 = arith.constant 0 : i32
    %c0_i32_0 = arith.constant 0 : i32
    %c0_i32_1 = arith.constant 0 : i32
    return %c0_i32, %c0_i32_0 : i32, i32
  }
  func.func @transform_11(%arg0: i32) -> (i32, i32) {
    %c0_i32 = arith.constant 0 : i32
    %c0_i32_0 = arith.constant 0 : i32
    return %arg0, %c0_i32 : i32, i32
  }
}

</mosaic_0001>

<bundles_post_ra>
// kernel: tpu_custom_call.1
= control target key start
LH: loop header
LB: loop body
LE: loop exit
PB: predicated region body
PF: predicated region fallthrough
CT: control target
= control target key end

     0   :  { %16 = vsyncpa [#allocation3], 0  ;;  %s2480_s0 = inlined_call_operand.hbm [shape: f32[8,256], index: 0, kind: input, shape index: {}]   ;;  %s2481_s1 = inlined_call_operand.hbm [shape: bf16[256,512], index: 1, kind: input, shape index: {}]   ;;  %s2482_s2 = inlined_call_operand.vmem [shape: f32[1,512], index: 2, kind: input, shape index: {}]   ;;  %s2483_s3 = inlined_call_operand.hbm [shape: bf16[512,256], index: 3, kind: input, shape index: {}]   ;;  %s2484_s4 = inlined_call_operand.vmem [shape: f32[1,256], index: 4, kind: input, shape index: {}]   ;;  %s2485_s5 = inlined_call_operand.hbm [shape: bf16[256,128], index: 5, kind: input, shape index: {}]   ;;  %s2486_s6 = inlined_call_operand.vmem [shape: f32[1,128], index: 6, kind: input, shape index: {}]   ;;  %s2487_s7 = inlined_call_operand.hbm [shape: bf16[128,128], index: 7, kind: input, shape index: {}]   ;;  %s2488_s8 = inlined_call_operand.vmem [shape: f32[1,128], index: 8, kind: input, shape index: {}]   ;;  %s2489_s9 = inlined_call_operand.hbm [shape: bf16[128,128], index: 9, kind: input, shape index: {}]   ;;  %s2490_s10 = inlined_call_operand.vmem [shape: f32[1,128], index: 10, kind: input, shape index: {}]   ;;  %s2491_s11 = inlined_call_operand.hbm [shape: bf16[8,128], index: 11, kind: output, shape index: {}]  }
   0x1   :  { %17 = vsyncpa [#allocation6], 0 }
   0x2   :  { %18 = vsyncpa [#allocation9], 0 }
   0x3   :  { %19 = vsyncpa [#allocation12], 0 }
   0x4   :  { %20 = vsyncpa [#allocation4], 0  ;;  %s2232_s17 = smov [#allocation5]   ;;  %s2068_s21 = scalar_lea.hbm %s2481_s1, 8192 }
   0x5   :  { %s36_s18 = sshll.u32 %s2232_s17, 4  ;;  %p2069_p0 = scmp.ne.s32.totalorder %s2481_s1, %s2068_s21  ;;  %s37_s18 = int_to_ptr.vmem [resolvable:$true] %s36_s18 }
   0x6   :  { %p2072_p1 = scmp.lt.u32.totalorder %s2068_s21, %s2481_s1 }
   0x8   :  { %p2074_p2 = pnand %p2072_p1, %p2069_p0 }
   0xa   :  { %2077 = shalt.err (!%p2074_p2)
}
   0xb   :  { %s2078_s26 = scalar_lea.vmem %s37_s18, 8192  ;;  %p2083_p4 = scmp.lt.s32.totalorder %s37_s18, %s37_s18 }
   0xc   :  { %p2079_p3 = scmp.ne.s32.totalorder %s37_s18, %s2078_s26  ;;  %p2084_p5 = scmp.lt.s32.totalorder %s2078_s26, %s2078_s26 }
   0xe   :  { %p2085_p6 = por %p2084_p5, %p2083_p4 }
  0x10   :  { %p2086_p7 = pnand %p2085_p6, %p2079_p3 }
  0x12   :  { %2089 = shalt.err (!%p2086_p7)
}
  0x13   :  { %s2233_s27 = smov 256   ;;  %s2234_s28 = smov 16  }
  0x14   :  { %42 = dma.hbm_to_vmem [thread:$0]  %s2481_s1, 8192, %s37_s18, [#allocation6], %s2233_s27, %s2233_s27, %s2234_s28  }
  0x15   :  { %s2235_s12 = smov [#allocation8]   ;;  %s2090_s16 = scalar_lea.hbm %s2485_s5, 2048 }
  0x16   :  { %s64_s13 = sshll.u32 %s2235_s12, 4  ;;  %p2091_p8 = scmp.ne.s32.totalorder %s2485_s5, %s2090_s16  ;;  %s65_s13 = int_to_ptr.vmem [resolvable:$true] %s64_s13 }
  0x17   :  { %p2094_p9 = scmp.lt.u32.totalorder %s2090_s16, %s2485_s5 }
  0x19   :  { %p2096_p10 = pnand %p2094_p9, %p2091_p8 }
  0x1b   :  { %2099 = shalt.err (!%p2096_p10)
}
  0x1c   :  { %s2100_s22 = scalar_lea.vmem %s65_s13, 2048  ;;  %p2105_p12 = scmp.lt.s32.totalorder %s65_s13, %s65_s13 }
  0x1d   :  { %p2101_p11 = scmp.ne.s32.totalorder %s65_s13, %s2100_s22  ;;  %p2106_p13 = scmp.lt.s32.totalorder %s2100_s22, %s2100_s22 }
  0x1f   :  { %p2107_p0 = por %p2106_p13, %p2105_p12 }
  0x21   :  { %p2108_p1 = pnand %p2107_p0, %p2101_p11 }
  0x23   :  { %2111 = shalt.err (!%p2108_p1)
}
  0x24   :  { %s2236_s1 = smov 64   ;;  %s2237_s18 = smov 4  }
  0x25   :  { %70 = dma.hbm_to_vmem [thread:$0]  %s2485_s5, 2048, %s65_s13, [#allocation9], %s2236_s1, %s2236_s1, %s2237_s18  }
  0x26   :  { %s2238_s25 = smov [#allocation2]   ;;  %s2239_s27 = smov [#allocation7]  }
  0x27   :  { %s27_s26 = sshll.u32 %s2238_s25, 4  ;;  %s50_s28 = sshll.u32 %s2239_s27, 4  ;;  %s28_s26 = int_to_ptr.vmem [resolvable:$true] %s27_s26  ;;  %s2335_s28 = int_to_ptr.vmem [resolvable:$true] %s50_s28 }
  0x28   :  { %s2112_s12 = scalar_lea.hbm %s2480_s0, 256 }
  0x29   :  { %p2113_p2 = scmp.ne.s32.totalorder %s2480_s0, %s2112_s12  ;;  %p2116_p3 = scmp.lt.u32.totalorder %s2112_s12, %s2480_s0 }
  0x2b   :  { %p2118_p4 = pnand %p2116_p3, %p2113_p2 }
  0x2d   :  { %2121 = shalt.err (!%p2118_p4)
}
  0x2e   :  { %s2122_s5 = scalar_lea.vmem %s28_s26, 256  ;;  %p2127_p6 = scmp.lt.s32.totalorder %s28_s26, %s28_s26 }
  0x2f   :  { %p2123_p5 = scmp.ne.s32.totalorder %s28_s26, %s2122_s5  ;;  %p2128_p7 = scmp.lt.s32.totalorder %s2122_s5, %s2122_s5 }
  0x31   :  { %p2129_p8 = por %p2128_p7, %p2127_p6 }
  0x33   :  { %p2130_p9 = pnand %p2129_p8, %p2123_p5 }
  0x35   :  { %2133 = shalt.err (!%p2130_p9)
}
  0x36   :  { %30 = dma.hbm_to_vmem [thread:$0]  %s2480_s0, 256, %s28_s26, [#allocation3]  }
  0x37   :  { %s2134_s22 = scalar_lea.hbm %s2483_s3, 8192 }
  0x38   :  { %p2135_p10 = scmp.ne.s32.totalorder %s2483_s3, %s2134_s22  ;;  %p2138_p11 = scmp.lt.u32.totalorder %s2134_s22, %s2483_s3 }
  0x3a   :  { %p2140_p12 = pnand %p2138_p11, %p2135_p10 }
  0x3c   :  { %2143 = shalt.err (!%p2140_p12)
}
  0x3d   :  { %s2144_s29 = scalar_lea.vmem %s2335_s28, 8192  ;;  %p2149_p0 = scmp.lt.s32.totalorder %s2335_s28, %s2335_s28 }
  0x3e   :  { %p2145_p13 = scmp.ne.s32.totalorder %s2335_s28, %s2144_s29  ;;  %p2150_p1 = scmp.lt.s32.totalorder %s2144_s29, %s2144_s29 }
  0x40   :  { %p2151_p2 = por %p2150_p1, %p2149_p0 }
  0x42   :  { %p2152_p3 = pnand %p2151_p2, %p2145_p13 }
  0x44   :  { %2155 = shalt.err (!%p2152_p3)
}
  0x45   :  { %s2240_s0 = smov 128   ;;  %s2241_s26 = smov 8  }
  0x46   :  { %56 = dma.hbm_to_vmem [thread:$0]  %s2483_s3, 8192, %s2335_s28, [#allocation6], %s2240_s0, %s2240_s0, %s2241_s26  }
  0x47   :  { %s2242_s14 = smov [#allocation10]   ;;  %s2243_s16 = smov [#allocation11]  }
  0x48   :  { %s78_s15 = sshll.u32 %s2242_s14, 4  ;;  %s92_s17 = sshll.u32 %s2243_s16, 4  ;;  %s79_s15 = int_to_ptr.vmem [resolvable:$true] %s78_s15  ;;  %s2366_s17 = int_to_ptr.vmem [resolvable:$true] %s92_s17 }
  0x49   :  { %s2156_s19 = scalar_lea.hbm %s2487_s7, 1024 }
  0x4a   :  { %p2157_p4 = scmp.ne.s32.totalorder %s2487_s7, %s2156_s19  ;;  %p2160_p5 = scmp.lt.u32.totalorder %s2156_s19, %s2487_s7 }
  0x4c   :  { %p2162_p6 = pnand %p2160_p5, %p2157_p4 }
  0x4e   :  { %2165 = shalt.err (!%p2162_p6)
}
  0x4f   :  { %s2166_s3 = scalar_lea.vmem %s79_s15, 1024  ;;  %p2171_p8 = scmp.lt.s32.totalorder %s79_s15, %s79_s15 }
  0x50   :  { %p2167_p7 = scmp.ne.s32.totalorder %s79_s15, %s2166_s3  ;;  %p2172_p9 = scmp.lt.s32.totalorder %s2166_s3, %s2166_s3 }
  0x52   :  { %p2173_p10 = por %p2172_p9, %p2171_p8 }
  0x54   :  { %p2174_p11 = pnand %p2173_p10, %p2167_p7 }
  0x56   :  { %2177 = shalt.err (!%p2174_p11)
}
  0x57   :  { %84 = dma.hbm_to_vmem [thread:$0]  %s2487_s7, 1024, %s79_s15, [#allocation9], %s2236_s1, %s2236_s1, %s2237_s18  }
  0x58   :  { %s2178_s29 = scalar_lea.hbm %s2489_s9, 1024 }
  0x59   :  { %p2179_p12 = scmp.ne.s32.totalorder %s2489_s9, %s2178_s29  ;;  %p2182_p13 = scmp.lt.u32.totalorder %s2178_s29, %s2489_s9 }
  0x5b   :  { %p2184_p0 = pnand %p2182_p13, %p2179_p12 }
  0x5d   :  { %2187 = shalt.err (!%p2184_p0)
}
  0x5e   :  { %s2188_s14 = scalar_lea.vmem %s2366_s17, 1024  ;;  %p2193_p2 = scmp.lt.s32.totalorder %s2366_s17, %s2366_s17 }
  0x5f   :  { %p2189_p1 = scmp.ne.s32.totalorder %s2366_s17, %s2188_s14  ;;  %p2194_p3 = scmp.lt.s32.totalorder %s2188_s14, %s2188_s14 }
  0x61   :  { %p2195_p4 = por %p2194_p3, %p2193_p2 }
  0x63   :  { %p2196_p5 = pnand %p2195_p4, %p2189_p1 }
  0x65   :  { %2199 = shalt.err (!%p2196_p5)
}
  0x66   :  { %98 = dma.hbm_to_vmem [thread:$0]  %s2489_s9, 1024, %s2366_s17, [#allocation12], %s2236_s1, %s2236_s1, %s2237_s18  }
  0x67   :  { %2222 = dma.done.wait [#allocation3], 256  }
  0x68   :  { %2223 = vsyncadd [#allocation3], 4294967040 }
  0x69   :  { %2224 = dma.done.wait [#allocation6], 16384  }
  0x6a   :  { %2225 = vsyncadd [#allocation6], 4294950912 }
  0x6b   :  { %2226 = dma.done.wait [#allocation9], 3072  }
  0x6c   :  { %2227 = vsyncadd [#allocation9], 4294964224 }
  0x6d   :  { %2228 = dma.done.wait [#allocation12], 1024  }
  0x6e   :  { %2229 = vsyncadd [#allocation12], 4294966272  ;;  %v1844_v0 = vld [vmem:[#allocation5 + $0x4] ss:$16 sps:$4 sm:$0xff]   ;;  %v1846_v1 = vld [vmem:[#allocation5] ss:$16 sps:$4 sm:$0xff]  }
  0x6f   :  { %508 = vmatprep.subr.bf16.mxu0 %v1844_v0  ;;  %v1847_v2 = vld [vmem:[#allocation5 + $0x24] ss:$16 sps:$4 sm:$0xff]   ;;  %v1849_v3 = vld [vmem:[#allocation5 + $0x20] ss:$16 sps:$4 sm:$0xff]   ;;  %v1891_v13 = vld [vmem:[#allocation5 + $0xc] ss:$16 sps:$4 sm:$0xff]  }
  0x70   :  { %509 = vmatpush1.bf16.msra.mxu0 %v1846_v1  ;;  %v1850_v4 = vld [vmem:[#allocation5 + $0x44] ss:$16 sps:$4 sm:$0xff]   ;;  %v1852_v5 = vld [vmem:[#allocation5 + $0x40] ss:$16 sps:$4 sm:$0xff]   ;;  %v1894_v15 = vld [vmem:[#allocation5 + $0x8] ss:$16 sps:$4 sm:$0xff]   ;;  %549 = vmatprep.subr.bf16.mxu1 %v1891_v13 }
  0x71   :  { %510 = vmatprep.subr.bf16.mxu0 %v1847_v2  ;;  %v1853_v6 = vld [vmem:[#allocation5 + $0x64] ss:$16 sps:$4 sm:$0xff]   ;;  %v1855_v7 = vld [vmem:[#allocation5 + $0x60] ss:$16 sps:$4 sm:$0xff]   ;;  %v121_v16 = vld [vmem:[#allocation2 + $0x8] sm:$0xff]  ;;  %550 = vmatpush1.bf16.msra.mxu1 %v1894_v15  ;;  %vm2246_vm0 = vmmov 0  }
  0x72   :  { %v1856_v8 = vld [vmem:[#allocation5 + $0x84] ss:$16 sps:$4 sm:$0xff]   ;;  %v1858_v9 = vld [vmem:[#allocation5 + $0x80] ss:$16 sps:$4 sm:$0xff]   ;;  %v123_v18 = vpack.c.bf16 %v121_v16, %v121_v16  ;;  %v1895_v19 = vld [vmem:[#allocation5 + $0x2c] ss:$16 sps:$4 sm:$0xff]  }
  0x73   :  { %v1859_v10 = vld [vmem:[#allocation5 + $0xa4] ss:$16 sps:$4 sm:$0xff]   ;;  %v1861_v11 = vld [vmem:[#allocation5 + $0xa0] ss:$16 sps:$4 sm:$0xff]   ;;  %v1897_v20 = vld [vmem:[#allocation5 + $0x28] ss:$16 sps:$4 sm:$0xff]   ;;  %551 = vmatprep.subr.bf16.mxu1 %v1895_v19 }
  0x74   :  { %511 = vmatpush1.bf16.msra.mxu0 %v1849_v3  ;;  %v1862_v12 = vld [vmem:[#allocation5 + $0xc4] ss:$16 sps:$4 sm:$0xff]   ;;  %v1864_v14 = vld [vmem:[#allocation5 + $0xc0] ss:$16 sps:$4 sm:$0xff]   ;;  %540 = vmatprep.mubr.bf16.mxu0 %v123_v18  ;;  %v1898_v21 = vld [vmem:[#allocation5 + $0x4c] ss:$16 sps:$4 sm:$0xff]  }
  0x75   :  { %512 = vmatprep.subr.bf16.mxu0 %v1850_v4  ;;  %v1865_v17 = vld [vmem:[#allocation5 + $0xe4] ss:$16 sps:$4 sm:$0xff]   ;;  %581 = vmatprep.mubr.bf16.mxu1 %v123_v18  ;;  %v1867_v22 = vld [vmem:[#allocation5 + $0xe0] ss:$16 sps:$4 sm:$0xff]   ;;  %v1900_v24 = vld [vmem:[#allocation5 + $0x48] ss:$16 sps:$4 sm:$0xff]  }
  0x76   :  { %v1868_v23 = vld [vmem:[#allocation5 + $0x104] ss:$16 sps:$4 sm:$0xff]   ;;  %552 = vmatpush1.bf16.msra.mxu1 %v1897_v20  ;;  %v1901_v25 = vld [vmem:[#allocation5 + $0x6c] ss:$16 sps:$4 sm:$0xff]   ;;  %v1870_v26 = vld [vmem:[#allocation5 + $0x100] ss:$16 sps:$4 sm:$0xff]  }
  0x77   :  { %553 = vmatprep.subr.bf16.mxu1 %v1898_v21  ;;  %v1871_v27 = vld [vmem:[#allocation5 + $0x124] ss:$16 sps:$4 sm:$0xff]   ;;  %v1903_v28 = vld [vmem:[#allocation5 + $0x68] ss:$16 sps:$4 sm:$0xff]   ;;  %v1904_v29 = vld [vmem:[#allocation5 + $0x8c] ss:$16 sps:$4 sm:$0xff]  }
  0x78   :  { %513 = vmatpush1.bf16.msra.mxu0 %v1852_v5  ;;  %v1873_v30 = vld [vmem:[#allocation5 + $0x120] ss:$16 sps:$4 sm:$0xff]   ;;  %v1874_v31 = vld [vmem:[#allocation5 + $0x144] ss:$16 sps:$4 sm:$0xff]   ;;  %v1906_v32 = vld [vmem:[#allocation5 + $0x88] ss:$16 sps:$4 sm:$0xff]  }
  0x79   :  { %514 = vmatprep.subr.bf16.mxu0 %v1853_v6  ;;  %v1907_v33 = vld [vmem:[#allocation5 + $0xac] ss:$16 sps:$4 sm:$0xff]   ;;  %v1876_v34 = vld [vmem:[#allocation5 + $0x140] ss:$16 sps:$4 sm:$0xff]   ;;  %v1877_v35 = vld [vmem:[#allocation5 + $0x164] ss:$16 sps:$4 sm:$0xff]  }
  0x7a   :  { %554 = vmatpush1.bf16.msra.mxu1 %v1900_v24  ;;  %v1909_v36 = vld [vmem:[#allocation5 + $0xa8] ss:$16 sps:$4 sm:$0xff]   ;;  %v1910_v37 = vld [vmem:[#allocation5 + $0xcc] ss:$16 sps:$4 sm:$0xff]   ;;  %v1879_v38 = vld [vmem:[#allocation5 + $0x160] ss:$16 sps:$4 sm:$0xff]  }
  0x7b   :  { %555 = vmatprep.subr.bf16.mxu1 %v1901_v25  ;;  %v1880_v39 = vld [vmem:[#allocation5 + $0x184] ss:$16 sps:$4 sm:$0xff]   ;;  %v1912_v40 = vld [vmem:[#allocation5 + $0xc8] ss:$16 sps:$4 sm:$0xff]   ;;  %v1913_v41 = vld [vmem:[#allocation5 + $0xec] ss:$16 sps:$4 sm:$0xff]  }
  0x7c   :  { %515 = vmatpush1.bf16.msra.mxu0 %v1855_v7  ;;  %v1882_v42 = vld [vmem:[#allocation5 + $0x180] ss:$16 sps:$4 sm:$0xff]   ;;  %v1883_v43 = vld [vmem:[#allocation5 + $0x1a4] ss:$16 sps:$4 sm:$0xff]   ;;  %v1915_v44 = vld [vmem:[#allocation5 + $0xe8] ss:$16 sps:$4 sm:$0xff]  }
  0x7d   :  { %516 = vmatprep.subr.bf16.mxu0 %v1856_v8  ;;  %v1916_v45 = vld [vmem:[#allocation5 + $0x10c] ss:$16 sps:$4 sm:$0xff]   ;;  %v1885_v46 = vld [vmem:[#allocation5 + $0x1a0] ss:$16 sps:$4 sm:$0xff]   ;;  %v1886_v47 = vld [vmem:[#allocation5 + $0x1c4] ss:$16 sps:$4 sm:$0xff]  }
  0x7e   :  { %556 = vmatpush1.bf16.msra.mxu1 %v1903_v28  ;;  %v1918_v48 = vld [vmem:[#allocation5 + $0x108] ss:$16 sps:$4 sm:$0xff]   ;;  %v1919_v49 = vld [vmem:[#allocation5 + $0x12c] ss:$16 sps:$4 sm:$0xff]   ;;  %v1888_v50 = vld [vmem:[#allocation5 + $0x1c0] ss:$16 sps:$4 sm:$0xff]  }
  0x7f   :  { %557 = vmatprep.subr.bf16.mxu1 %v1904_v29  ;;  %v1889_v51 = vld [vmem:[#allocation5 + $0x1e4] ss:$16 sps:$4 sm:$0xff]   ;;  %v1921_v52 = vld [vmem:[#allocation5 + $0x128] ss:$16 sps:$4 sm:$0xff]   ;;  %v1922_v53 = vld [vmem:[#allocation5 + $0x14c] ss:$16 sps:$4 sm:$0xff]  }
  0x80   :  { %517 = vmatpush1.bf16.msra.mxu0 %v1858_v9  ;;  %v1893_v54 = vld [vmem:[#allocation5 + $0x1e0] ss:$16 sps:$4 sm:$0xff]   ;;  %v1924_v56 = vld [vmem:[#allocation5 + $0x148] ss:$16 sps:$4 sm:$0xff]   ;;  %v1942_v57 = vld [vmem:[#allocation7 + $0x4] ss:$8 sps:$4 sm:$0xff]  }
  0x81   :  { %518 = vmatprep.subr.bf16.mxu0 %v1859_v10  ;;  %v120_v55 = vld [vmem:[#allocation2] sm:$0xff]  ;;  %v1925_v58 = vld [vmem:[#allocation5 + $0x16c] ss:$16 sps:$4 sm:$0xff]   ;;  %v1940_v59 = vld [vmem:[#allocation7] ss:$8 sps:$4 sm:$0xff]   ;;  %s2247_s19 = smov [#allocation13]  }
  0x82   :  { %558 = vmatpush1.bf16.msra.mxu1 %v1906_v32  ;;  %v122_v60 = vpack.c.bf16 %v120_v55, %v120_v55  ;;  %v1927_v61 = vld [vmem:[#allocation5 + $0x168] ss:$16 sps:$4 sm:$0xff]   ;;  %v1945_v62 = vld [vmem:[#allocation7 + $0x14] ss:$8 sps:$4 sm:$0xff]   ;;  %v1948_v2 = vld [vmem:[#allocation7 + $0x24] ss:$8 sps:$4 sm:$0xff]  }
  0x83   :  { %559 = vmatprep.subr.bf16.mxu1 %v1907_v33  ;;  %v1928_v63 = vld [vmem:[#allocation5 + $0x18c] ss:$16 sps:$4 sm:$0xff]   ;;  %v1943_v0 = vld [vmem:[#allocation7 + $0x10] ss:$8 sps:$4 sm:$0xff]   ;;  %v1946_v4 = vld [vmem:[#allocation7 + $0x20] ss:$8 sps:$4 sm:$0xff]  }
  0x84   :  { %519 = vmatpush1.bf16.msra.mxu0 %v1861_v11  ;;  %v1930_v1 = vld [vmem:[#allocation5 + $0x188] ss:$16 sps:$4 sm:$0xff]   ;;  %v1931_v3 = vld [vmem:[#allocation5 + $0x1ac] ss:$16 sps:$4 sm:$0xff]  }
  0x85   :  { %520 = vmatprep.subr.bf16.mxu0 %v1862_v12  ;;  %v1933_v5 = vld [vmem:[#allocation5 + $0x1a8] ss:$16 sps:$4 sm:$0xff]   ;;  %v1951_v6 = vld [vmem:[#allocation7 + $0x34] ss:$8 sps:$4 sm:$0xff]   ;;  %v1954_v10 = vld [vmem:[#allocation7 + $0x44] ss:$8 sps:$4 sm:$0xff]  }
  0x86   :  { %560 = vmatpush1.bf16.msra.mxu1 %v1909_v36  ;;  %v1934_v7 = vld [vmem:[#allocation5 + $0x1cc] ss:$16 sps:$4 sm:$0xff]   ;;  %v1949_v8 = vld [vmem:[#allocation7 + $0x30] ss:$8 sps:$4 sm:$0xff]   ;;  %v1952_v12 = vld [vmem:[#allocation7 + $0x40] ss:$8 sps:$4 sm:$0xff]  }
  0x87   :  { %561 = vmatprep.subr.bf16.mxu1 %v1910_v37  ;;  %v1936_v9 = vld [vmem:[#allocation5 + $0x1c8] ss:$16 sps:$4 sm:$0xff]   ;;  %v1937_v11 = vld [vmem:[#allocation5 + $0x1ec] ss:$16 sps:$4 sm:$0xff]   ;;  %v596_v37 = vlaneseq }
  0x88   :  { %521 = vmatpush1.bf16.msra.mxu0 %v1864_v14  ;;  %v1939_v13 = vld [vmem:[#allocation5 + $0x1e8] ss:$16 sps:$4 sm:$0xff]   ;;  %v1957_v14 = vld [vmem:[#allocation7 + $0x54] ss:$8 sps:$4 sm:$0xff]   ;;  %v1960_v16 = vld [vmem:[#allocation7 + $0x64] ss:$8 sps:$4 sm:$0xff]  }
  0x89   :  { %522 = vmatprep.subr.bf16.mxu0 %v1865_v17  ;;  %v1955_v15 = vld [vmem:[#allocation7 + $0x50] ss:$8 sps:$4 sm:$0xff]   ;;  %v1958_v17 = vld [vmem:[#allocation7 + $0x60] ss:$8 sps:$4 sm:$0xff]   ;;  %v1963_v18 = vld [vmem:[#allocation7 + $0x74] ss:$8 sps:$4 sm:$0xff]  }
  0x8a   :  { %562 = vmatpush1.bf16.msra.mxu1 %v1912_v40  ;;  %v1961_v19 = vld [vmem:[#allocation7 + $0x70] ss:$8 sps:$4 sm:$0xff]   ;;  %v1966_v20 = vld [vmem:[#allocation7 + $0x84] ss:$8 sps:$4 sm:$0xff]   ;;  %v1964_v21 = vld [vmem:[#allocation7 + $0x80] ss:$8 sps:$4 sm:$0xff]  }
  0x8b   :  { %563 = vmatprep.subr.bf16.mxu1 %v1913_v41  ;;  %v1972_v24 = vld [vmem:[#allocation7 + $0xa4] ss:$8 sps:$4 sm:$0xff]   ;;  %v1970_v25 = vld [vmem:[#allocation7 + $0xa0] ss:$8 sps:$4 sm:$0xff]   ;;  %v594_v40 = vld [vmem:[%s2482_s2] sm:$0xf] }
  0x8c   :  { %523 = vmatpush1.bf16.msra.mxu0 %v1867_v22  ;;  %v1969_v22 = vld [vmem:[#allocation7 + $0x94] ss:$8 sps:$4 sm:$0xff]   ;;  %v1978_v28 = vld [vmem:[#allocation7 + $0xc4] ss:$8 sps:$4 sm:$0xff]   ;;  %v1976_v29 = vld [vmem:[#allocation7 + $0xc0] ss:$8 sps:$4 sm:$0xff]  }
  0x8d   :  { %524 = vmatprep.subr.bf16.mxu0 %v1868_v23  ;;  %v1967_v23 = vld [vmem:[#allocation7 + $0x90] ss:$8 sps:$4 sm:$0xff]   ;;  %v1984_v32 = vld [vmem:[#allocation7 + $0xe4] ss:$8 sps:$4 sm:$0xff]   ;;  %v1982_v33 = vld [vmem:[#allocation7 + $0xe0] ss:$8 sps:$4 sm:$0xff]  }
  0x8e   :  { %564 = vmatpush1.bf16.msra.mxu1 %v1915_v44  ;;  %v1990_v36 = vld [vmem:[#allocation7 + $0x104] ss:$8 sps:$4 sm:$0xff]  }
  0x8f   :  { %565 = vmatprep.subr.bf16.mxu1 %v1916_v45  ;;  %v2038_v44 = vld [vmem:[#allocation8 + $0x48] sm:$0xff]  }
  0x90   :  { %525 = vmatpush1.bf16.msra.mxu0 %v1870_v26  ;;  %v1975_v26 = vld [vmem:[#allocation7 + $0xb4] ss:$8 sps:$4 sm:$0xff]   ;;  %v2039_v45 = vld [vmem:[#allocation8 + $0x8] sm:$0xff]  }
  0x91   :  { %526 = vmatprep.subr.bf16.mxu0 %v1871_v27  ;;  %v1973_v27 = vld [vmem:[#allocation7 + $0xb0] ss:$8 sps:$4 sm:$0xff]  }
  0x92   :  { %566 = vmatpush1.bf16.msra.mxu1 %v1918_v48  ;;  %v2042_v48 = vld [vmem:[#allocation8 + $0x58] sm:$0xff]  }
  0x93   :  { %567 = vmatprep.subr.bf16.mxu1 %v1919_v49  ;;  %v2043_v49 = vld [vmem:[#allocation8 + $0x18] sm:$0xff]  }
  0x94   :  { %527 = vmatpush1.bf16.msra.mxu0 %v1873_v30  ;;  %v1981_v30 = vld [vmem:[#allocation7 + $0xd4] ss:$8 sps:$4 sm:$0xff]  }
  0x95   :  { %528 = vmatprep.subr.bf16.mxu0 %v1874_v31  ;;  %v1979_v31 = vld [vmem:[#allocation7 + $0xd0] ss:$8 sps:$4 sm:$0xff]  }
  0x96   :  { %568 = vmatpush1.bf16.msra.mxu1 %v1921_v52  ;;  %v2046_v52 = vld [vmem:[#allocation8 + $0x68] sm:$0xff]  }
  0x97   :  { %569 = vmatprep.subr.bf16.mxu1 %v1922_v53  ;;  %v2047_v53 = vld [vmem:[#allocation8 + $0x28] sm:$0xff]  }
  0x98   :  { %529 = vmatpush1.bf16.msra.mxu0 %v1876_v34  ;;  %v1987_v34 = vld [vmem:[#allocation7 + $0xf4] ss:$8 sps:$4 sm:$0xff]  }
  0x99   :  { %530 = vmatprep.subr.bf16.mxu0 %v1877_v35  ;;  %v1985_v35 = vld [vmem:[#allocation7 + $0xf0] ss:$8 sps:$4 sm:$0xff]  }
  0x9a   :  { %570 = vmatpush1.bf16.msra.mxu1 %v1924_v56 }
  0x9b   :  { %571 = vmatprep.subr.bf16.mxu1 %v1925_v58 }
  0x9c   :  { %531 = vmatpush1.bf16.msra.mxu0 %v1879_v38  ;;  %v2403_v38 = vshrl.u32 %v596_v37, 7  ;;  %v2003_v37 = vld [vmem:[#allocation7 + $0x150] ss:$8 sps:$4 sm:$0xff]  }
  0x9d   :  { %532 = vmatprep.subr.bf16.mxu0 %v1880_v39 }
  0x9e   :  { %572 = vmatpush1.bf16.msra.mxu1 %v1927_v61  ;;  %v606_v39 = vsub.s32 2, %v2403_v38  ;;  %v602_v55 = vsub.s32 1, %v2403_v38 }
  0x9f   :  { %573 = vmatprep.subr.bf16.mxu1 %v1928_v63 }
  0xa0   :  { %533 = vmatpush1.bf16.msra.mxu0 %v1882_v42  ;;  %v607_v41 = vrot.slane %v594_v40, %v606_v39  ;;  %v2036_v42 = vld [vmem:[#allocation8 + $0x40] sm:$0xff]  }
  0xa1   :  { %534 = vmatprep.subr.bf16.mxu0 %v1883_v43  ;;  %v2037_v43 = vld [vmem:[#allocation8] sm:$0xff]  }
  0xa2   :  { %574 = vmatpush1.bf16.msra.mxu1 %v1930_v1  ;;  %v2008_v39 = vld [vmem:[#allocation7 + $0x164] ss:$8 sps:$4 sm:$0xff]  }
  0xa3   :  { %575 = vmatprep.subr.bf16.mxu1 %v1931_v3 }
  0xa4   :  { %535 = vmatpush1.bf16.msra.mxu0 %v1885_v46  ;;  %v2040_v46 = vld [vmem:[#allocation8 + $0x50] sm:$0xff]  }
  0xa5   :  { %536 = vmatprep.subr.bf16.mxu0 %v1886_v47  ;;  %v2041_v47 = vld [vmem:[#allocation8 + $0x10] sm:$0xff]  }
  0xa6   :  { %576 = vmatpush1.bf16.msra.mxu1 %v1933_v5 }
  0xa7   :  { %577 = vmatprep.subr.bf16.mxu1 %v1934_v7 }
  0xa8   :  { %537 = vmatpush1.bf16.msra.mxu0 %v1888_v50  ;;  %v2044_v50 = vld [vmem:[#allocation8 + $0x60] sm:$0xff]  }
  0xa9   :  { %538 = vmatprep.subr.bf16.mxu0 %v1889_v51  ;;  %v2045_v51 = vld [vmem:[#allocation8 + $0x20] sm:$0xff]  }
  0xaa   :  { %578 = vmatpush1.bf16.msra.mxu1 %v1936_v9  ;;  %v2244_v9 = vmov 0  }
  0xab   :  { %579 = vmatprep.subr.bf16.mxu1 %v1937_v11  ;;  %v1988_v11 = vld [vmem:[#allocation7 + $0x100] ss:$8 sps:$4 sm:$0xff]  }
  0xac   :  { %539 = vmatpush1.bf16.msra.mxu0 %v1893_v54  ;;  %v2410_v54 = vsub.s32 0, %v2403_v38 }
  0xad   :  { %1040 = vmatprep.subr.bf16.mxu0 %v1942_v57  ;;  %v603_v57 = vrot.slane %v594_v40, %v602_v55 }
  0xae   :  { %580 = vmatpush1.bf16.msra.mxu1 %v1939_v13  ;;  %v599_v56 = vrot.slane %v594_v40, %v2410_v54  ;;  %v1993_v13 = vld [vmem:[#allocation7 + $0x114] ss:$8 sps:$4 sm:$0xff]  }
  0xaf   :  { %541 = vmatmul.mubr.bf16.vlgmr.msra.gmra.mrb[0].mxu0 %v122_v60  ;;  %1744 = vmatprep.subr.bf16.mxu1 %v2036_v42  ;;  %v2011_v42 = vld [vmem:[#allocation7 + $0x174] ss:$8 sps:$4 sm:$0xff]  }
  0xb0   :  { %1041 = vmatpush1.bf16.msra.mxu0 %v1940_v59  ;;  %v616_v58 = vpack.c.bf16 %v599_v56, %v599_v56  ;;  %v617_v59 = vpack.c.bf16 %v603_v57, %v603_v57  ;;  %v2029_v56 = vld [vmem:[#allocation7 + $0x1d4] ss:$8 sps:$4 sm:$0xff]   ;;  %v2027_v57 = vld [vmem:[#allocation7 + $0x1d0] ss:$8 sps:$4 sm:$0xff]  }
  0xb1   :  { %1042 = vmatprep.subr.bf16.mxu0 %v1945_v62  ;;  %582 = vmatmul.mubr.bf16.vlgmr.msra.gmra.mrb[0].mxu1 %v122_v60 }
  0xb2   :  { %1745 = vmatpush3.bf16.msra.mxu1 %v2037_v43  ;;  %v621_v60 = vpack.i.b16 %v616_v58, %v616_v58  ;;  %v628_v61 = vpack.i.b16 %v617_v59, %v617_v59  ;;  %v2009_v43 = vld [vmem:[#allocation7 + $0x170] ss:$8 sps:$4 sm:$0xff]   ;;  %v2032_v58 = vld [vmem:[#allocation7 + $0x1e4] ss:$8 sps:$4 sm:$0xff]   ;;  %v2030_v59 = vld [vmem:[#allocation7 + $0x1e0] ss:$8 sps:$4 sm:$0xff]  }
  0xb3   :  { %1746 = vmatprep.subr.bf16.mxu1 %v2038_v44  ;;  %v2014_v44 = vld [vmem:[#allocation7 + $0x184] ss:$8 sps:$4 sm:$0xff]  }
  0xb4   :  { %1043 = vmatpush1.bf16.msra.mxu0 %v1943_v0  ;;  %v626_v62 = vrot.slane %v621_v60, %v2410_v54  ;;  %v633_v0 = vrot.slane %v628_v61, %v2410_v54  ;;  %v2035_v60 = vld [vmem:[#allocation7 + $0x1f4] ss:$8 sps:$4 sm:$0xff]   ;;  %v2033_v61 = vld [vmem:[#allocation7 + $0x1f0] ss:$8 sps:$4 sm:$0xff]  }
  0xb5   :  { %1044 = vmatprep.subr.bf16.mxu0 %v1948_v2 }
  0xb6   :  { %1747 = vmatpush3.bf16.msra.mxu1 %v2039_v45  ;;  %v2012_v45 = vld [vmem:[#allocation7 + $0x180] ss:$8 sps:$4 sm:$0xff]  }
  0xb7   :  { %1748 = vmatprep.subr.bf16.mxu1 %v2040_v46  ;;  %v2017_v46 = vld [vmem:[#allocation7 + $0x194] ss:$8 sps:$4 sm:$0xff]  }
  0xb8   :  { %1045 = vmatpush1.bf16.msra.mxu0 %v1946_v4 }
  0xb9   :  { %1046 = vmatprep.subr.bf16.mxu0 %v1951_v6 }
  0xba   :  { %1749 = vmatpush3.bf16.msra.mxu1 %v2041_v47  ;;  %v2015_v47 = vld [vmem:[#allocation7 + $0x190] ss:$8 sps:$4 sm:$0xff]  }
  0xbb   :  { %1750 = vmatprep.subr.bf16.mxu1 %v2042_v48  ;;  %v2020_v48 = vld [vmem:[#allocation7 + $0x1a4] ss:$8 sps:$4 sm:$0xff]  }
  0xbc   :  { %1047 = vmatpush1.bf16.msra.mxu0 %v1949_v8  ;;  %v610_v8 = vsub.s32 3, %v2403_v38  ;;  %v2052_v38 = vld [vmem:[#allocation10] sm:$0xff]  }
  0xbd   :  { %1048 = vmatprep.subr.bf16.mxu0 %v1954_v10 }
  0xbe   :  { %1751 = vmatpush3.bf16.msra.mxu1 %v2043_v49  ;;  %v2018_v49 = vld [vmem:[#allocation7 + $0x1a0] ss:$8 sps:$4 sm:$0xff]  }
  0xbf   :  { %1752 = vmatprep.subr.bf16.mxu1 %v2044_v50  ;;  %v2023_v50 = vld [vmem:[#allocation7 + $0x1b4] ss:$8 sps:$4 sm:$0xff]  }
  0xc0   :  { %1049 = vmatpush1.bf16.msra.mxu0 %v1952_v12 }
  0xc1   :  { %1050 = vmatprep.subr.bf16.mxu0 %v1957_v14  ;;  %v611_v14 = vrot.slane %v594_v40, %v610_v8 }
  0xc2   :  { %1753 = vmatpush3.bf16.msra.mxu1 %v2045_v51  ;;  %v2021_v51 = vld [vmem:[#allocation7 + $0x1b0] ss:$8 sps:$4 sm:$0xff]  }
  0xc3   :  { %1754 = vmatprep.subr.bf16.mxu1 %v2046_v52  ;;  %v2026_v52 = vld [vmem:[#allocation7 + $0x1c4] ss:$8 sps:$4 sm:$0xff]  }
  0xc4   :  { %1051 = vmatpush1.bf16.msra.mxu0 %v1955_v15  ;;  %v1991_v15 = vld [vmem:[#allocation7 + $0x110] ss:$8 sps:$4 sm:$0xff]  }
  0xc5   :  { %1052 = vmatprep.subr.bf16.mxu0 %v1960_v16  ;;  %v1996_v16 = vld [vmem:[#allocation7 + $0x124] ss:$8 sps:$4 sm:$0xff]  }
  0xc6   :  { %1755 = vmatpush3.bf16.msra.mxu1 %v2047_v53  ;;  %v2024_v53 = vld [vmem:[#allocation7 + $0x1c0] ss:$8 sps:$4 sm:$0xff]  }
  0xc8   :  { %1053 = vmatpush1.bf16.msra.mxu0 %v1958_v17  ;;  %v618_v17 = vpack.c.bf16 %v607_v41, %v607_v41  ;;  %v2006_v41 = vld [vmem:[#allocation7 + $0x160] ss:$8 sps:$4 sm:$0xff]  }
  0xc9   :  { %1054 = vmatprep.subr.bf16.mxu0 %v1963_v18  ;;  %v619_v18 = vpack.c.bf16 %v611_v14, %v611_v14 }
  0xcc   :  { %1055 = vmatpush1.bf16.msra.mxu0 %v1961_v19  ;;  %v1994_v19 = vld [vmem:[#allocation7 + $0x120] ss:$8 sps:$4 sm:$0xff]  }
  0xcd   :  { %1056 = vmatprep.subr.bf16.mxu0 %v1966_v20  ;;  %v1999_v20 = vld [vmem:[#allocation7 + $0x134] ss:$8 sps:$4 sm:$0xff]  }
  0xd0   :  { %1057 = vmatpush1.bf16.msra.mxu0 %v1964_v21  ;;  %v635_v21 = vpack.i.b16 %v618_v17, %v618_v17 }
  0xd1   :  { %1058 = vmatprep.subr.bf16.mxu0 %v1969_v22  ;;  %v642_v22 = vpack.i.b16 %v619_v18, %v619_v18 }
  0xd4   :  { %1059 = vmatpush1.bf16.msra.mxu0 %v1967_v23  ;;  %v1997_v23 = vld [vmem:[#allocation7 + $0x130] ss:$8 sps:$4 sm:$0xff]  }
  0xd5   :  { %1060 = vmatprep.subr.bf16.mxu0 %v1972_v24  ;;  %v2002_v24 = vld [vmem:[#allocation7 + $0x144] ss:$8 sps:$4 sm:$0xff]  }
  0xd8   :  { %1061 = vmatpush1.bf16.msra.mxu0 %v1970_v25  ;;  %v640_v25 = vrot.slane %v635_v21, %v2410_v54 }
  0xd9   :  { %1062 = vmatprep.subr.bf16.mxu0 %v1975_v26 }
  0xdc   :  { %1063 = vmatpush1.bf16.msra.mxu0 %v1973_v27  ;;  %v647_v27 = vrot.slane %v642_v22, %v2410_v54 }
  0xdd   :  { %1064 = vmatprep.subr.bf16.mxu0 %v1978_v28  ;;  %v2000_v28 = vld [vmem:[#allocation7 + $0x140] ss:$8 sps:$4 sm:$0xff]  }
  0xe0   :  { %1065 = vmatpush1.bf16.msra.mxu0 %v1976_v29 }
  0xe1   :  { %1066 = vmatprep.subr.bf16.mxu0 %v1981_v30 }
  0xe4   :  { %1067 = vmatpush1.bf16.msra.mxu0 %v1979_v31  ;;  %v2005_v31 = vld [vmem:[#allocation7 + $0x154] ss:$8 sps:$4 sm:$0xff]  }
  0xe5   :  { %1068 = vmatprep.subr.bf16.mxu0 %v1984_v32 }
  0xe8   :  { %1069 = vmatpush1.bf16.msra.mxu0 %v1982_v33 }
  0xe9   :  { %1070 = vmatprep.subr.bf16.mxu0 %v1987_v34 }
  0xec   :  { %1071 = vmatpush1.bf16.msra.mxu0 %v1985_v35 }
  0xed   :  { %1081 = vmatprep.subr.bf16.mxu0 %v1990_v36 }
 0x182   :  { %v542_v63 = vpop.f32.mrb[0].mxu0 }
 0x183   :  { %v590_v1 = vpack.c.bf16 %v542_v63, %v542_v63  ;;  %v544_v2 = vpop.f32.mrb[1].mxu0  ;;  %v2048_v63 = vld [vmem:[#allocation8 + $0x70] sm:$0xff]  }
 0x184   :  { %v591_v3 = vpack.c.bf16 %v544_v2, %v544_v2  ;;  %v546_v4 = vpop.f32.mrb[2].mxu0  ;;  %v583_v26 = vpop.f32.mrb[0].mxu1  ;;  %1756 = vmatprep.subr.bf16.mxu1 %v2048_v63  ;;  %v2051_v2 = vld [vmem:[#allocation8 + $0x38] sm:$0xff]  }
 0x185   :  { %v648_v5 = vadd.bf16 %v626_v62, %v590_v1  ;;  %v547_v6 = vpop.f32.mrb[3].mxu0  ;;  %v592_v29 = vpack.c.bf16 %v583_v26, %v583_v26  ;;  %v585_v30 = vpop.f32.mrb[1].mxu1  ;;  %v2050_v1 = vld [vmem:[#allocation8 + $0x78] sm:$0xff]   ;;  %v1124_v4 = vld [vmem:[%s2484_s4] sm:$0x3]  ;;  %v2056_v26 = vld [vmem:[#allocation10 + $0x20] sm:$0xff]  }
 0x186   :  { %v649_v7 = vadd.bf16 %v633_v0, %v591_v3  ;;  %v593_v32 = vpack.c.bf16 %v585_v30, %v585_v30  ;;  %v587_v33 = vpop.f32.mrb[2].mxu1  ;;  %v2049_v0 = vld [vmem:[#allocation8 + $0x30] sm:$0xff]   ;;  %v2245_v3 = vmov 0.0   ;;  %v1133_v6 = vrot.slane %v1124_v4, %v602_v55 }
 0x187   :  { %v652_v12 = vmax.bf16 %v2244_v9, %v648_v5  ;;  %v650_v34 = vadd.bf16 %v640_v25, %v592_v29  ;;  %v588_v35 = vpop.f32.mrb[3].mxu1  ;;  %1757 = vmatpush3.bf16.msra.mxu1 %v2049_v0  ;;  %v1129_v5 = vrot.slane %v1124_v4, %v2410_v54  ;;  %v2055_v25 = vld [vmem:[#allocation10 + $0x18] sm:$0xff]   ;;  %v1325_v30 = vld [vmem:[%s2486_s6] sm:$0x1] }
 0x188   :  { %v653_v10 = vmax.bf16 %v2244_v9, %v649_v7  ;;  %v651_v36 = vadd.bf16 %v647_v27, %v593_v32  ;;  %1758 = vmatprep.subr.bf16.mxu1 %v2050_v1  ;;  %v1137_v8 = vpack.c.bf16 %v1133_v6, %v1133_v6  ;;  %v2057_v27 = vld [vmem:[#allocation10 + $0x28] sm:$0xff]   ;;  %v2059_v29 = vld [vmem:[#allocation10 + $0x38] sm:$0xff]   ;;  %v1735_v0 = vld [vmem:[%s2490_s10] ss:$0 sm:$0xff] }
 0x189   :  { %v654_v62 = vmax.bf16 %v2244_v9, %v650_v34  ;;  %v1136_v7 = vpack.c.bf16 %v1129_v5, %v1129_v5 }
 0x18a   :  { %1072 = vmatprep.mubr.bf16.mxu0 %v653_v10  ;;  %v655_v40 = vmax.bf16 %v2244_v9, %v651_v36 }
 0x18b   :  { %1073 = vmatmul.mubr.bf16.vlgmr.msra.gmra.mrb[4].mxu0 %v652_v12  ;;  %1759 = vmatpush3.bf16.msra.mxu1 %v2051_v2  ;;  %v1139_v10 = vpack.i.b16 %v1136_v7, %v1136_v7 }
 0x18c   :  { %1082 = vmatpush1.bf16.msra.mxu0 %v1988_v11  ;;  %1113 = vmatprep.mubr.bf16.mxu0 %v655_v40  ;;  %v1146_v11 = vpack.i.b16 %v1137_v8, %v1137_v8 }
 0x18d   :  { %1083 = vmatprep.subr.bf16.mxu0 %v1993_v13  ;;  %1784 = vmatprep.subr.bf16.mxu1 %v2245_v3  ;;  %v1144_v12 = vrot.slane %v1139_v10, %v2410_v54 }
 0x18e   :  { %v1151_v14 = vrot.slane %v1146_v11, %v2410_v54 }
 0x190   :  { %1084 = vmatpush1.bf16.msra.mxu0 %v1991_v15 }
 0x191   :  { %1085 = vmatprep.subr.bf16.mxu0 %v1996_v16 }
 0x194   :  { %1086 = vmatpush1.bf16.msra.mxu0 %v1994_v19 }
 0x195   :  { %1087 = vmatprep.subr.bf16.mxu0 %v1999_v20 }
 0x198   :  { %1088 = vmatpush1.bf16.msra.mxu0 %v1997_v23  ;;  %v2053_v23 = vld [vmem:[#allocation10 + $0x8] sm:$0xff]  }
 0x199   :  { %1089 = vmatprep.subr.bf16.mxu0 %v2002_v24  ;;  %v2054_v24 = vld [vmem:[#allocation10 + $0x10] sm:$0xff]  }
 0x19c   :  { %1090 = vmatpush1.bf16.msra.mxu0 %v2000_v28  ;;  %v2058_v28 = vld [vmem:[#allocation10 + $0x30] sm:$0xff]  }
 0x19d   :  { %1091 = vmatprep.subr.bf16.mxu0 %v2005_v31  ;;  %v1326_v31 = vpack.c.bf16 %v1325_v30, %v1325_v30 }
 0x19f   :  { %v1328_v32 = vpack.i.b16 %v1326_v31, %v1326_v31 }
 0x1a0   :  { %1092 = vmatpush1.bf16.msra.mxu0 %v2003_v37 }
 0x1a1   :  { %1093 = vmatprep.subr.bf16.mxu0 %v2008_v39  ;;  %v1333_v36 = vrot.slane %v1328_v32, %v2410_v54 }
 0x1a4   :  { %1094 = vmatpush1.bf16.msra.mxu0 %v2006_v41 }
 0x1a5   :  { %1095 = vmatprep.subr.bf16.mxu0 %v2011_v42  ;;  %v2060_v42 = vld [vmem:[#allocation11] sm:$0xff]  }
 0x1a8   :  { %1096 = vmatpush1.bf16.msra.mxu0 %v2009_v43 }
 0x1a9   :  { %1097 = vmatprep.subr.bf16.mxu0 %v2014_v44  ;;  %v2061_v44 = vld [vmem:[#allocation11 + $0x8] sm:$0xff]  }
 0x1ac   :  { %1098 = vmatpush1.bf16.msra.mxu0 %v2012_v45  ;;  %v2062_v45 = vld [vmem:[#allocation11 + $0x10] sm:$0xff]  }
 0x1ad   :  { %1099 = vmatprep.subr.bf16.mxu0 %v2017_v46  ;;  %v2063_v46 = vld [vmem:[#allocation11 + $0x18] sm:$0xff]  }
 0x1b0   :  { %1100 = vmatpush1.bf16.msra.mxu0 %v2015_v47  ;;  %v2064_v47 = vld [vmem:[#allocation11 + $0x20] sm:$0xff]  }
 0x1b1   :  { %1101 = vmatprep.subr.bf16.mxu0 %v2020_v48  ;;  %v2065_v48 = vld [vmem:[#allocation11 + $0x28] sm:$0xff]  }
 0x1b4   :  { %1102 = vmatpush1.bf16.msra.mxu0 %v2018_v49  ;;  %v2066_v49 = vld [vmem:[#allocation11 + $0x30] sm:$0xff]  }
 0x1b5   :  { %1103 = vmatprep.subr.bf16.mxu0 %v2023_v50  ;;  %v2067_v50 = vld [vmem:[#allocation11 + $0x38] sm:$0xff]  }
 0x1b8   :  { %1104 = vmatpush1.bf16.msra.mxu0 %v2021_v51  ;;  %v1441_v51 = vld [vmem:[%s2488_s8] sm:$0x1]  ;;  %s1571_s8 = sshll.u32 %s2247_s19, 4  ;;  %s1572_s8 = int_to_ptr.vmem [resolvable:$true] %s1571_s8 }
 0x1b9   :  { %1105 = vmatprep.subr.bf16.mxu0 %v2026_v52  ;;  %v1442_v52 = vpack.c.bf16 %v1441_v51, %v1441_v51  ;;  %s2200_s20 = scalar_lea.vmem %s1572_s8, 64  ;;  %p2205_p7 = scmp.lt.s32.totalorder %s1572_s8, %s1572_s8 }
 0x1ba   :  { %p2201_p6 = scmp.ne.s32.totalorder %s1572_s8, %s2200_s20  ;;  %p2206_p8 = scmp.lt.s32.totalorder %s2200_s20, %s2200_s20 }
 0x1bc   :  { %1106 = vmatpush1.bf16.msra.mxu0 %v2024_v53  ;;  %v1444_v53 = vpack.i.b16 %v1442_v52, %v1442_v52  ;;  %p2207_p9 = por %p2206_p8, %p2205_p7 }
 0x1bd   :  { %1107 = vmatprep.subr.bf16.mxu0 %v2029_v56 }
 0x1be   :  { %v1449_v56 = vrot.slane %v1444_v53, %v2410_v54  ;;  %p2208_p10 = pnand %p2207_p9, %p2201_p6 }
 0x1c0   :  { %1108 = vmatpush1.bf16.msra.mxu0 %v2027_v57 }
 0x1c1   :  { %1109 = vmatprep.subr.bf16.mxu0 %v2032_v58 }
 0x1c4   :  { %1110 = vmatpush1.bf16.msra.mxu0 %v2030_v59 }
 0x1c5   :  { %1111 = vmatprep.subr.bf16.mxu0 %v2035_v60 }
 0x1c8   :  { %1112 = vmatpush1.bf16.msra.mxu0 %v2033_v61 }
 0x1cb   :  { %1114 = vmatmul.mubr.bf16.vlgmr.msra.gmra.mrb[4].mxu0 %v654_v62 }
 0x29e   :  { %v1115_v13 = vpop.f32.mrb[4].mxu0 }
 0x29f   :  { %v1122_v15 = vpack.c.bf16 %v1115_v13, %v1115_v13  ;;  %v1117_v16 = vpop.f32.mrb[5].mxu0 }
 0x2a0   :  { %v1123_v17 = vpack.c.bf16 %v1117_v16, %v1117_v16  ;;  %v1119_v18 = vpop.f32.mrb[6].mxu0 }
 0x2a1   :  { %v1152_v19 = vadd.bf16 %v1144_v12, %v1122_v15  ;;  %v1120_v20 = vpop.f32.mrb[7].mxu0 }
 0x2a2   :  { %v1153_v21 = vadd.bf16 %v1151_v14, %v1123_v17 }
 0x2a3   :  { %v1154_v55 = vmax.bf16 %v2244_v9, %v1152_v19 }
 0x2a4   :  { %v1155_v22 = vmax.bf16 %v2244_v9, %v1153_v21 }
 0x2a6   :  { %1316 = vmatprep.mubr.bf16.mxu1 %v1155_v22 }
 0x2a7   :  { %1317 = vmatmul.mubr.bf16.vlgmr.msra.gmra.mrb[4].mxu1 %v1154_v55 }
 0x2a8   :  { %1785 = vmatpush3.bf16.msra.mxu1 %v2052_v38  ;;  %1800 = vmatprep.mubr.msk.bf16.mxu1 %vm2246_vm0, %v2245_v3 }
 0x2a9   :  { %1786 = vmatprep.subr.bf16.mxu1 %v2245_v3 }
 0x2ac   :  { %1787 = vmatpush3.bf16.msra.mxu1 %v2053_v23 }
 0x2ad   :  { %1788 = vmatprep.subr.bf16.mxu1 %v2245_v3 }
 0x2b0   :  { %1789 = vmatpush3.bf16.msra.mxu1 %v2054_v24 }
 0x2b1   :  { %1790 = vmatprep.subr.bf16.mxu1 %v2245_v3 }
 0x2b4   :  { %1791 = vmatpush3.bf16.msra.mxu1 %v2055_v25 }
 0x2b5   :  { %1792 = vmatprep.subr.bf16.mxu1 %v2245_v3 }
 0x2b8   :  { %1793 = vmatpush3.bf16.msra.mxu1 %v2056_v26 }
 0x2b9   :  { %1794 = vmatprep.subr.bf16.mxu1 %v2245_v3 }
 0x2bc   :  { %1795 = vmatpush3.bf16.msra.mxu1 %v2057_v27 }
 0x2bd   :  { %1796 = vmatprep.subr.bf16.mxu1 %v2245_v3 }
 0x2c0   :  { %1797 = vmatpush3.bf16.msra.mxu1 %v2058_v28 }
 0x2c1   :  { %1798 = vmatprep.subr.bf16.mxu1 %v2245_v3 }
 0x2c4   :  { %1799 = vmatpush3.bf16.msra.mxu1 %v2059_v29 }
 0x2c5   :  { %1804 = vmatprep.subr.bf16.mxu1 %v2245_v3 }
 0x37a   :  { %v1760_v33 = vpop.f32.mrb[4].mxu1 }
 0x37b   :  { %v1761_v34 = vpop.f32.mrb[5].mxu1 }
 0x37c   :  { %v1762_v35 = vadd.f32 %v1761_v34, %v1760_v33  ;;  %v1763_v37 = vpop.f32.mrb[6].mxu1 }
 0x37d   :  { %v1764_v39 = vpop.f32.mrb[7].mxu1 }
 0x37e   :  { %v1324_v40 = vpack.c.bf16 %v1762_v35, %v1762_v35 }
 0x380   :  { %v1334_v41 = vadd.bf16 %v1333_v36, %v1324_v40 }
 0x382   :  { %v1335_v43 = vmax.bf16 %v2244_v9, %v1334_v41 }
 0x384   :  { %1801 = vmatmul.mubr.bf16.vlgmr.msra.gmra.mrb[8].mxu1 %v1335_v43 }
 0x385   :  { %1805 = vmatpush3.bf16.msra.mxu1 %v2060_v42  ;;  %1820 = vmatprep.mubr.msk.bf16.mxu1 %vm2246_vm0, %v2245_v3 }
 0x386   :  { %1806 = vmatprep.subr.bf16.mxu1 %v2245_v3 }
 0x389   :  { %1807 = vmatpush3.bf16.msra.mxu1 %v2061_v44 }
 0x38a   :  { %1808 = vmatprep.subr.bf16.mxu1 %v2245_v3 }
 0x38d   :  { %1809 = vmatpush3.bf16.msra.mxu1 %v2062_v45 }
 0x38e   :  { %1810 = vmatprep.subr.bf16.mxu1 %v2245_v3 }
 0x391   :  { %1811 = vmatpush3.bf16.msra.mxu1 %v2063_v46 }
 0x392   :  { %1812 = vmatprep.subr.bf16.mxu1 %v2245_v3 }
 0x395   :  { %1813 = vmatpush3.bf16.msra.mxu1 %v2064_v47 }
 0x396   :  { %1814 = vmatprep.subr.bf16.mxu1 %v2245_v3 }
 0x399   :  { %1815 = vmatpush3.bf16.msra.mxu1 %v2065_v48 }
 0x39a   :  { %1816 = vmatprep.subr.bf16.mxu1 %v2245_v3 }
 0x39d   :  { %1817 = vmatpush3.bf16.msra.mxu1 %v2066_v49 }
 0x39e   :  { %1818 = vmatprep.subr.bf16.mxu1 %v2245_v3 }
 0x3a1   :  { %1819 = vmatpush3.bf16.msra.mxu1 %v2067_v50 }
 0x457   :  { %v1434_v57 = vpop.f32.mrb[8].mxu1 }
 0x458   :  { %v1440_v58 = vpack.c.bf16 %v1434_v57, %v1434_v57  ;;  %v1802_v59 = vpop.f32.mrb[9].mxu1 }
 0x459   :  { %v1437_v60 = vpop.f32.mrb[10].mxu1 }
 0x45a   :  { %v1450_v61 = vadd.bf16 %v1449_v56, %v1440_v58  ;;  %v1803_v62 = vpop.f32.mrb[11].mxu1 }
 0x45c   :  { %v1451_v63 = vmax.bf16 %v2244_v9, %v1450_v61 }
 0x45e   :  { %1821 = vmatmul.mubr.bf16.vlgmr.msra.gmra.mrb[12].mxu1 %v1451_v63 }
 0x531   :  { %v1557_v1 = vpop.f32.mrb[12].mxu1 }
 0x532   :  { %v1558_v2 = vadd.f32 %v1735_v0, %v1557_v1  ;;  %v1822_v3 = vpop.f32.mrb[13].mxu1 }
 0x533   :  { %v1560_v4 = vpop.f32.mrb[14].mxu1 }
 0x534   :  { %v1563_v54 = vpack.c.bf16 %v1558_v2, %v1558_v2  ;;  %v1823_v5 = vpop.f32.mrb[15].mxu1 }
 0x536   :  { %1564 = vst [vmem:[#allocation13] sm:$0xf] %v1563_v54 }
 0x537   :  { %2211 = shalt.err (!%p2208_p10)
}
 0x538   :  { %s2212_s10 = scalar_lea.hbm %s2491_s11, 64 }
 0x539   :  { %p2213_p11 = scmp.ne.s32.totalorder %s2491_s11, %s2212_s10  ;;  %p2216_p12 = scmp.lt.u32.totalorder %s2212_s10, %s2491_s11 }
 0x53b   :  { %p2218_p13 = pnand %p2216_p12, %p2213_p11 }
 0x53d   :  { %2221 = shalt.err (!%p2218_p13)
}
 0x53e   :  { %1574 = dma.vmem_to_hbm [thread:$0]  %s1572_s8, 64, %s2491_s11, [#allocation4]  }
 0x53f   :  { %2230 = dma.done.wait [#allocation4], 64  }
 0x540   :  { %2231 = vsyncadd [#allocation4], 4294967232 }
 0x541   :  { %1578 = vsyncpa [#allocation3], 1 }
 0x542   :  { %1579 = vsyncpa [#allocation6], 1 }
 0x543   :  { %1580 = vsyncpa [#allocation9], 1 }
 0x544   :  { %1581 = vsyncpa [#allocation12], 1 }
 0x545   :  { %1582 = vsyncpa [#allocation4], 1 }

</bundles_post_ra>
